<compile_context>
chip_gen: v7x
topology: tpu7x:2x2x1
jax: 0.10.0
libtpu: 0.0.40
codegen_flags: <defaults>
</compile_context>

<pallas_src>
import jax
import jax.numpy as jnp
from jax.experimental import pallas as pl
from jax.experimental.pallas import tpu as pltpu

EPS = 1e-5


# ----------------------------------------------------------------------------
# Kernel 1: conv-as-matmul (transposed orientation) + per-channel stats
#   y_t = w_t @ patches_t        (C, K) @ (K, tm) -> (C, tm)   lane-dense
#   stats accumulated as full (C, tm) slabs (VPU adds only), dumped per outer
#   grid chunk; final per-channel reduction happens in the wrapper.
# ----------------------------------------------------------------------------
def conv_stats_kernel(w_ref, p_ref, y_ref, psum_ref, pssq_ref, acc_s, acc_q):
    i = pl.program_id(1)

    @pl.when(i == 0)
    def _():
        acc_s[...] = jnp.zeros_like(acc_s)
        acc_q[...] = jnp.zeros_like(acc_q)

    y = jnp.dot(w_ref[...], p_ref[...], preferred_element_type=jnp.float32)
    y_ref[...] = y
    acc_s[...] += y
    acc_q[...] += y * y

    @pl.when(i == pl.num_programs(1) - 1)
    def _():
        psum_ref[...] = acc_s[...]
        pssq_ref[...] = acc_q[...]


def conv_matmul_stats(patches_t, w_t, tm=512):
    """patches_t: (K, M_pad) bf16, w_t: (Cout, K) bf16 -> y (Cout, M_pad) f32,
    per-channel sum / sum-of-squares (Cout,) f32."""
    K, Mp = patches_t.shape
    Cout = w_t.shape[0]
    assert Mp % tm == 0
    T = Mp // tm
    # Outer "parallel" axis unlocks megacore sharding on v7x; inner axis carries
    # the stats accumulator and stays "arbitrary".
    G0 = 2 if (T >= 2 and T % 2 == 0) else 1
    G1 = T // G0

    y, psum, pssq = pl.pallas_call(
        conv_stats_kernel,
        out_shape=(
            jax.ShapeDtypeStruct((Cout, Mp), jnp.float32),
            jax.ShapeDtypeStruct((Cout, G0 * tm), jnp.float32),
            jax.ShapeDtypeStruct((Cout, G0 * tm), jnp.float32),
        ),
        grid_spec=pltpu.PrefetchScalarGridSpec(
            num_scalar_prefetch=0,
            grid=(G0, G1),
            in_specs=[
                pl.BlockSpec((Cout, K), lambda o, i: (0, 0)),
                pl.BlockSpec((K, tm), lambda o, i: (0, o * G1 + i)),
            ],
            out_specs=[
                pl.BlockSpec((Cout, tm), lambda o, i: (0, o * G1 + i)),
                pl.BlockSpec((Cout, tm), lambda o, i: (0, o)),
                pl.BlockSpec((Cout, tm), lambda o, i: (0, o)),
            ],
            scratch_shapes=[
                pltpu.VMEM((Cout, tm), jnp.float32),
                pltpu.VMEM((Cout, tm), jnp.float32),
            ],
        ),
        compiler_params=pltpu.CompilerParams(
            dimension_semantics=("parallel", "arbitrary"),
        ),
    )(w_t, patches_t)

    s = jnp.sum(psum, axis=1)   # cheap wrapper-side reduction (Cout,)
    q = jnp.sum(pssq, axis=1)
    return y, s, q


# ----------------------------------------------------------------------------
# Kernel 2: fused BN affine (+ optional residual) + ReLU, lane-dense (C, tm)
# ----------------------------------------------------------------------------
def bn_relu_kernel(y_ref, scale_ref, bias_ref, o_ref):
    v = y_ref[...] * scale_ref[...] + bias_ref[...]
    o_ref[...] = jnp.maximum(v, 0.0).astype(o_ref.dtype)


def bn_add_relu_kernel(y_ref, scale_ref, bias_ref, res_ref, o_ref):
    v = y_ref[...] * scale_ref[...] + bias_ref[...] + res_ref[...]
    o_ref[...] = jnp.maximum(v, 0.0).astype(o_ref.dtype)


def bn_act(y, scale, bias, residual=None, out_dtype=jnp.float32, tm=512):
    Cout, Mp = y.shape
    assert Mp % tm == 0
    T = Mp // tm

    args = [y, scale, bias]
    in_specs = [
        pl.BlockSpec((Cout, tm), lambda i: (0, i)),
        pl.BlockSpec((Cout, 1), lambda i: (0, 0)),
        pl.BlockSpec((Cout, 1), lambda i: (0, 0)),
    ]
    kernel = bn_relu_kernel
    if residual is not None:
        args.append(residual)
        in_specs.append(pl.BlockSpec((Cout, tm), lambda i: (0, i)))
        kernel = bn_add_relu_kernel

    return pl.pallas_call(
        kernel,
        out_shape=jax.ShapeDtypeStruct((Cout, Mp), out_dtype),
        grid_spec=pltpu.PrefetchScalarGridSpec(
            num_scalar_prefetch=0,
            grid=(T,),
            in_specs=in_specs,
            out_specs=pl.BlockSpec((Cout, tm), lambda i: (0, i)),
        ),
        compiler_params=pltpu.CompilerParams(dimension_semantics=("parallel",)),
    )(*args)


# ----------------------------------------------------------------------------
# Glue: im2col (transposed layout) for 3x3x3, pad=1, stride=1
# ----------------------------------------------------------------------------
def im2col_3d_t(x_cndhw):
    """x: (C, N, D, H, W) -> (27*C, N*D*H*W); row order (kd, kh, kw, c)."""
    C, N, D, H, W = x_cndhw.shape
    xp = jnp.pad(x_cndhw, ((0, 0), (0, 0), (1, 1), (1, 1), (1, 1)))
    taps = []
    for kd in range(3):
        for kh in range(3):
            for kw in range(3):
                taps.append(
                    xp[:, :, kd:kd + D, kh:kh + H, kw:kw + W].reshape(C, -1)
                )
    return jnp.concatenate(taps, axis=0)  # (27*C, M)


def conv_weight_to_matrix_t(w):
    """PyTorch (Cout, Cin, kd, kh, kw) -> (Cout, 27*Cin) bf16, tap-major/cin-minor."""
    cout, cin = w.shape[0], w.shape[1]
    return jnp.transpose(w, (0, 2, 3, 4, 1)).reshape(cout, 27 * cin).astype(
        jnp.bfloat16
    )


def bn_affine_from_stats(s, q, m, gamma, beta):
    """Training-mode BatchNorm (biased batch variance) folded into scale/bias."""
    mean = s / m
    var = jnp.maximum(q / m - mean * mean, 0.0)  # guard cancellation
    scale = gamma.reshape(-1) * jax.lax.rsqrt(var + EPS)
    bias = beta.reshape(-1) - mean * scale
    return scale.reshape(-1, 1), bias.reshape(-1, 1)


def _pad_cols(a, m_pad):
    pad = m_pad - a.shape[1]
    if pad == 0:
        return a
    return jnp.pad(a, ((0, 0), (0, pad)))


# ----------------------------------------------------------------------------
# BasicBlock forward (stride=1, downsample=None -> in_planes == planes)
# ----------------------------------------------------------------------------
def basic_block_forward(x_ncdhw, params, tm=512):
    N, C, D, H, W = x_ncdhw.shape
    M = N * D * H * W
    M_pad = pl.cdiv(M, tm) * tm

    x_t = jnp.transpose(x_ncdhw, (1, 0, 2, 3, 4))          # (C, N, D, H, W)
    residual = _pad_cols(x_t.reshape(C, M), M_pad)          # (C, M_pad) f32

    # conv1 -> bn1 -> relu
    p1 = _pad_cols(im2col_3d_t(x_t.astype(jnp.bfloat16)), M_pad)
    y1, s1, q1 = conv_matmul_stats(p1, params["w1"], tm=tm)
    scale1, bias1 = bn_affine_from_stats(s1, q1, M, params["g1"], params["b1"])
    z1 = bn_act(y1, scale1, bias1, residual=None,
                out_dtype=jnp.bfloat16, tm=tm)               # (Cout, M_pad) bf16

    Cout = params["w1"].shape[0]
    z1_sp = z1[:, :M].reshape(Cout, N, D, H, W)

    # conv2 -> bn2 -> (+residual) -> relu
    p2 = _pad_cols(im2col_3d_t(z1_sp), M_pad)
    y2, s2, q2 = conv_matmul_stats(p2, params["w2"], tm=tm)
    scale2, bias2 = bn_affine_from_stats(s2, q2, M, params["g2"], params["b2"])
    out_t = bn_act(y2, scale2, bias2, residual=residual,
                   out_dtype=jnp.float32, tm=tm)             # (Cout, M_pad) f32

    out = out_t[:, :M].reshape(Cout, N, D, H, W)
    return jnp.transpose(out, (1, 0, 2, 3, 4))               # back to NCDHW


if __name__ == "__main__":
    key = jax.random.PRNGKey(0)
    k_x, k_w1, k_w2 = jax.random.split(key, 3)

    # Small shapes: batch=2, in_planes=planes=8, D=H=W=8 (stride=1, no downsample)
    N, Cin, Cout, D, H, W = 2, 8, 8, 8, 8, 8

    x = jax.random.normal(k_x, (N, Cin, D, H, W), dtype=jnp.float32)

    w1 = jax.random.normal(k_w1, (Cout, Cin, 3, 3, 3), jnp.float32) / jnp.sqrt(
        Cin * 27.0
    )
    w2 = jax.random.normal(k_w2, (Cout, Cout, 3, 3, 3), jnp.float32) / jnp.sqrt(
        Cout * 27.0
    )

    params = {
        "w1": conv_weight_to_matrix_t(w1),
        "w2": conv_weight_to_matrix_t(w2),
        # BatchNorm affine params: PyTorch defaults (gamma=1, beta=0)
        "g1": jnp.ones((Cout, 1), jnp.float32),
        "b1": jnp.zeros((Cout, 1), jnp.float32),
        "g2": jnp.ones((Cout, 1), jnp.float32),
        "b2": jnp.zeros((Cout, 1), jnp.float32),
    }

    out = jax.jit(basic_block_forward)(x, params)
    jax.block_until_ready(out)
    assert out.shape == (N, Cout, D, H, W)
    assert bool(jnp.all(jnp.isfinite(out)))
    print("KERNEL_OK")
</pallas_src>

<mosaic_0001>
module attributes {stable_mosaic.version = 11 : i64} {
  func.func @conv_stats_kernel(%arg0: i32, %arg1: i32, %arg2: memref<8x216xbf16, #tpu.memory_space<vmem>>, %arg3: memref<216x512xbf16, #tpu.memory_space<vmem>>, %arg4: memref<8x512xf32, #tpu.memory_space<vmem>>, %arg5: memref<8x512xf32, #tpu.memory_space<vmem>>, %arg6: memref<8x512xf32, #tpu.memory_space<vmem>>, %arg7: memref<8x512xf32, #tpu.memory_space<vmem>>, %arg8: memref<8x512xf32, #tpu.memory_space<vmem>>) attributes {dimension_semantics = [#tpu.dimension_semantics<parallel>, #tpu.dimension_semantics<arbitrary>], iteration_bounds = array<i64: 2, 1>, scalar_prefetch = 0 : i64, scratch_operands = 2 : i64, tpu.core_type = #tpu.core_type<tc>, window_params = [{pipeline_mode = #tpu.pipeline_mode<synchronous>, transform_indices = @transform_0, window_bounds = array<i64: 8, 216>}, {transform_indices = @transform_1, window_bounds = array<i64: 216, 512>}, {transform_indices = @transform_2, window_bounds = array<i64: 8, 512>}, {transform_indices = @transform_3, window_bounds = array<i64: 8, 512>}, {transform_indices = @transform_4, window_bounds = array<i64: 8, 512>}]} {
    %c0_i32 = arith.constant 0 : i32
    %0 = arith.cmpi eq, %arg1, %c0_i32 : i32
    %1 = arith.extui %0 : i1 to i32
    %c0_i32_0 = arith.constant 0 : i32
    %2 = arith.cmpi ne, %1, %c0_i32_0 : i32
    scf.if %2 {
      %cst_16 = arith.constant 0.000000e+00 : f32
      %17 = vector.broadcast %cst_16 : f32 to vector<8x512xf32>
      %c0_17 = arith.constant 0 : index
      %c0_18 = arith.constant 0 : index
      %18 = vector.load %arg7[%c0_17, %c0_18] : memref<8x512xf32, #tpu.memory_space<vmem>>, vector<8x512xf32>
      tpu.vector_store %arg7[%c0_17, %c0_18], %17 {strides = array<i32>} : memref<8x512xf32, #tpu.memory_space<vmem>>, vector<8x512xf32>,
      %cst_19 = arith.constant 0.000000e+00 : f32
      %19 = vector.broadcast %cst_19 : f32 to vector<8x512xf32>
      %c0_20 = arith.constant 0 : index
      %c0_21 = arith.constant 0 : index
      %20 = vector.load %arg8[%c0_20, %c0_21] : memref<8x512xf32, #tpu.memory_space<vmem>>, vector<8x512xf32>
      tpu.vector_store %arg8[%c0_20, %c0_21], %19 {strides = array<i32>} : memref<8x512xf32, #tpu.memory_space<vmem>>, vector<8x512xf32>,
    } else {
    }
    %c0 = arith.constant 0 : index
    %c0_1 = arith.constant 0 : index
    %3 = vector.load %arg2[%c0, %c0_1] : memref<8x216xbf16, #tpu.memory_space<vmem>>, vector<8x216xbf16>
    %c0_2 = arith.constant 0 : index
    %c0_3 = arith.constant 0 : index
    %4 = vector.load %arg3[%c0_2, %c0_3] : memref<216x512xbf16, #tpu.memory_space<vmem>>, vector<216x512xbf16>
    %cst = arith.constant dense<0.000000e+00> : vector<8x512xf32>
    %5 = tpu.matmul %3, %4, %cst {dimension_numbers = #tpu.dot_dimension_numbers<[1], [0], [0], [1], [0, 0, 1, 1], [], []>} : vector<8x216xbf16>, vector<216x512xbf16>, vector<8x512xf32> -> vector<8x512xf32>
    %c0_4 = arith.constant 0 : index
    %c0_5 = arith.constant 0 : index
    %6 = vector.load %arg4[%c0_4, %c0_5] : memref<8x512xf32, #tpu.memory_space<vmem>>, vector<8x512xf32>
    tpu.vector_store %arg4[%c0_4, %c0_5], %5 {strides = array<i32>} : memref<8x512xf32, #tpu.memory_space<vmem>>, vector<8x512xf32>,
    %c0_6 = arith.constant 0 : index
    %c0_7 = arith.constant 0 : index
    %7 = vector.load %arg7[%c0_6, %c0_7] : memref<8x512xf32, #tpu.memory_space<vmem>>, vector<8x512xf32>
    %8 = arith.addf %7, %5 : vector<8x512xf32>
    %c0_8 = arith.constant 0 : index
    %c0_9 = arith.constant 0 : index
    %9 = vector.load %arg7[%c0_8, %c0_9] : memref<8x512xf32, #tpu.memory_space<vmem>>, vector<8x512xf32>
    tpu.vector_store %arg7[%c0_8, %c0_9], %8 {strides = array<i32>} : memref<8x512xf32, #tpu.memory_space<vmem>>, vector<8x512xf32>,
    %c0_10 = arith.constant 0 : index
    %c0_11 = arith.constant 0 : index
    %10 = vector.load %arg8[%c0_10, %c0_11] : memref<8x512xf32, #tpu.memory_space<vmem>>, vector<8x512xf32>
    %11 = arith.mulf %5, %5 : vector<8x512xf32>
    %12 = arith.addf %10, %11 : vector<8x512xf32>
    %c0_12 = arith.constant 0 : index
    %c0_13 = arith.constant 0 : index
    %13 = vector.load %arg8[%c0_12, %c0_13] : memref<8x512xf32, #tpu.memory_space<vmem>>, vector<8x512xf32>
    tpu.vector_store %arg8[%c0_12, %c0_13], %12 {strides = array<i32>} : memref<8x512xf32, #tpu.memory_space<vmem>>, vector<8x512xf32>,
    %c0_i32_14 = arith.constant 0 : i32
    %14 = arith.cmpi eq, %arg1, %c0_i32_14 : i32
    %15 = arith.extui %14 : i1 to i32
    %c0_i32_15 = arith.constant 0 : i32
    %16 = arith.cmpi ne, %15, %c0_i32_15 : i32
    scf.if %16 {
      %c0_16 = arith.constant 0 : index
      %c0_17 = arith.constant 0 : index
      %17 = vector.load %arg7[%c0_16, %c0_17] : memref<8x512xf32, #tpu.memory_space<vmem>>, vector<8x512xf32>
      %c0_18 = arith.constant 0 : index
      %c0_19 = arith.constant 0 : index
      %18 = vector.load %arg5[%c0_18, %c0_19] : memref<8x512xf32, #tpu.memory_space<vmem>>, vector<8x512xf32>
      tpu.vector_store %arg5[%c0_18, %c0_19], %17 {strides = array<i32>} : memref<8x512xf32, #tpu.memory_space<vmem>>, vector<8x512xf32>,
      %c0_20 = arith.constant 0 : index
      %c0_21 = arith.constant 0 : index
      %19 = vector.load %arg8[%c0_20, %c0_21] : memref<8x512xf32, #tpu.memory_space<vmem>>, vector<8x512xf32>
      %c0_22 = arith.constant 0 : index
      %c0_23 = arith.constant 0 : index
      %20 = vector.load %arg6[%c0_22, %c0_23] : memref<8x512xf32, #tpu.memory_space<vmem>>, vector<8x512xf32>
      tpu.vector_store %arg6[%c0_22, %c0_23], %19 {strides = array<i32>} : memref<8x512xf32, #tpu.memory_space<vmem>>, vector<8x512xf32>,
    } else {
    }
    return
  }
  func.func @transform_0(%arg0: i32, %arg1: i32) -> (i32, i32) {
    %c0_i32 = arith.constant 0 : i32
    %c0_i32_0 = arith.constant 0 : i32
    %c0_i32_1 = arith.constant 0 : i32
    return %c0_i32, %c0_i32_0 : i32, i32
  }
  func.func @transform_1(%arg0: i32, %arg1: i32) -> (i32, i32) {
    %c1_i32 = arith.constant 1 : i32
    %0 = arith.muli %arg0, %c1_i32 : i32
    %1 = arith.addi %0, %arg1 : i32
    %c0_i32 = arith.constant 0 : i32
    %c0_i32_0 = arith.constant 0 : i32
    return %c0_i32, %1 : i32, i32
  }
  func.func @transform_2(%arg0: i32, %arg1: i32) -> (i32, i32) {
    %c1_i32 = arith.constant 1 : i32
    %0 = arith.muli %arg0, %c1_i32 : i32
    %1 = arith.addi %0, %arg1 : i32
    %c0_i32 = arith.constant 0 : i32
    %c0_i32_0 = arith.constant 0 : i32
    return %c0_i32, %1 : i32, i32
  }
  func.func @transform_3(%arg0: i32, %arg1: i32) -> (i32, i32) {
    %c0_i32 = arith.constant 0 : i32
    %c0_i32_0 = arith.constant 0 : i32
    return %c0_i32, %arg0 : i32, i32
  }
  func.func @transform_4(%arg0: i32, %arg1: i32) -> (i32, i32) {
    %c0_i32 = arith.constant 0 : i32
    %c0_i32_0 = arith.constant 0 : i32
    return %c0_i32, %arg0 : i32, i32
  }
}

module attributes {stable_mosaic.version = 11 : i64} {
  func.func @bn_relu_kernel(%arg0: i32, %arg1: memref<8x512xf32, #tpu.memory_space<vmem>>, %arg2: memref<8x1xf32, #tpu.memory_space<vmem>>, %arg3: memref<8x1xf32, #tpu.memory_space<vmem>>, %arg4: memref<8x512xbf16, #tpu.memory_space<vmem>>) attributes {dimension_semantics = [#tpu.dimension_semantics<parallel>], iteration_bounds = array<i64: 2>, scalar_prefetch = 0 : i64, scratch_operands = 0 : i64, tpu.core_type = #tpu.core_type<tc>, window_params = [{transform_indices = @transform_0, window_bounds = array<i64: 8, 512>}, {pipeline_mode = #tpu.pipeline_mode<synchronous>, transform_indices = @transform_1, window_bounds = array<i64: 8, 1>}, {pipeline_mode = #tpu.pipeline_mode<synchronous>, transform_indices = @transform_2, window_bounds = array<i64: 8, 1>}, {transform_indices = @transform_3, window_bounds = array<i64: 8, 512>}]} {
    %c0 = arith.constant 0 : index
    %c0_0 = arith.constant 0 : index
    %0 = vector.load %arg1[%c0, %c0_0] : memref<8x512xf32, #tpu.memory_space<vmem>>, vector<8x512xf32>
    %c0_1 = arith.constant 0 : index
    %c0_2 = arith.constant 0 : index
    %1 = vector.load %arg2[%c0_1, %c0_2] : memref<8x1xf32, #tpu.memory_space<vmem>>, vector<8x1xf32>
    %2 = vector.broadcast %1 : vector<8x1xf32> to vector<8x512xf32>
    %3 = arith.mulf %0, %2 : vector<8x512xf32>
    %c0_3 = arith.constant 0 : index
    %c0_4 = arith.constant 0 : index
    %4 = vector.load %arg3[%c0_3, %c0_4] : memref<8x1xf32, #tpu.memory_space<vmem>>, vector<8x1xf32>
    %5 = vector.broadcast %4 : vector<8x1xf32> to vector<8x512xf32>
    %6 = arith.addf %3, %5 : vector<8x512xf32>
    %cst = arith.constant 0.000000e+00 : f32
    %7 = vector.broadcast %cst : f32 to vector<8x512xf32>
    %8 = arith.maximumf %6, %7 : vector<8x512xf32>
    %9 = arith.truncf %8 : vector<8x512xf32> to vector<8x512xbf16>
    %c0_5 = arith.constant 0 : index
    %c0_6 = arith.constant 0 : index
    %10 = vector.load %arg4[%c0_5, %c0_6] : memref<8x512xbf16, #tpu.memory_space<vmem>>, vector<8x512xbf16>
    tpu.vector_store %arg4[%c0_5, %c0_6], %9 {strides = array<i32>} : memref<8x512xbf16, #tpu.memory_space<vmem>>, vector<8x512xbf16>,
    return
  }
  func.func @transform_0(%arg0: i32) -> (i32, i32) {
    %c0_i32 = arith.constant 0 : i32
    %c0_i32_0 = arith.constant 0 : i32
    return %c0_i32, %arg0 : i32, i32
  }
  func.func @transform_1(%arg0: i32) -> (i32, i32) {
    %c0_i32 = arith.constant 0 : i32
    %c0_i32_0 = arith.constant 0 : i32
    %c0_i32_1 = arith.constant 0 : i32
    return %c0_i32, %c0_i32_0 : i32, i32
  }
  func.func @transform_2(%arg0: i32) -> (i32, i32) {
    %c0_i32 = arith.constant 0 : i32
    %c0_i32_0 = arith.constant 0 : i32
    %c0_i32_1 = arith.constant 0 : i32
    return %c0_i32, %c0_i32_0 : i32, i32
  }
  func.func @transform_3(%arg0: i32) -> (i32, i32) {
    %c0_i32 = arith.constant 0 : i32
    %c0_i32_0 = arith.constant 0 : i32
    return %c0_i32, %arg0 : i32, i32
  }
}

module attributes {stable_mosaic.version = 11 : i64} {
  func.func @bn_add_relu_kernel(%arg0: i32, %arg1: memref<8x512xf32, #tpu.memory_space<vmem>>, %arg2: memref<8x1xf32, #tpu.memory_space<vmem>>, %arg3: memref<8x1xf32, #tpu.memory_space<vmem>>, %arg4: memref<8x512xf32, #tpu.memory_space<vmem>>, %arg5: memref<8x512xf32, #tpu.memory_space<vmem>>) attributes {dimension_semantics = [#tpu.dimension_semantics<parallel>], iteration_bounds = array<i64: 2>, scalar_prefetch = 0 : i64, scratch_operands = 0 : i64, tpu.core_type = #tpu.core_type<tc>, window_params = [{transform_indices = @transform_0, window_bounds = array<i64: 8, 512>}, {pipeline_mode = #tpu.pipeline_mode<synchronous>, transform_indices = @transform_1, window_bounds = array<i64: 8, 1>}, {pipeline_mode = #tpu.pipeline_mode<synchronous>, transform_indices = @transform_2, window_bounds = array<i64: 8, 1>}, {transform_indices = @transform_3, window_bounds = array<i64: 8, 512>}, {transform_indices = @transform_4, window_bounds = array<i64: 8, 512>}]} {
    %c0 = arith.constant 0 : index
    %c0_0 = arith.constant 0 : index
    %0 = vector.load %arg1[%c0, %c0_0] : memref<8x512xf32, #tpu.memory_space<vmem>>, vector<8x512xf32>
    %c0_1 = arith.constant 0 : index
    %c0_2 = arith.constant 0 : index
    %1 = vector.load %arg2[%c0_1, %c0_2] : memref<8x1xf32, #tpu.memory_space<vmem>>, vector<8x1xf32>
    %2 = vector.broadcast %1 : vector<8x1xf32> to vector<8x512xf32>
    %3 = arith.mulf %0, %2 : vector<8x512xf32>
    %c0_3 = arith.constant 0 : index
    %c0_4 = arith.constant 0 : index
    %4 = vector.load %arg3[%c0_3, %c0_4] : memref<8x1xf32, #tpu.memory_space<vmem>>, vector<8x1xf32>
    %5 = vector.broadcast %4 : vector<8x1xf32> to vector<8x512xf32>
    %6 = arith.addf %3, %5 : vector<8x512xf32>
    %c0_5 = arith.constant 0 : index
    %c0_6 = arith.constant 0 : index
    %7 = vector.load %arg4[%c0_5, %c0_6] : memref<8x512xf32, #tpu.memory_space<vmem>>, vector<8x512xf32>
    %8 = arith.addf %6, %7 : vector<8x512xf32>
    %cst = arith.constant 0.000000e+00 : f32
    %9 = vector.broadcast %cst : f32 to vector<8x512xf32>
    %10 = arith.maximumf %8, %9 : vector<8x512xf32>
    %c0_7 = arith.constant 0 : index
    %c0_8 = arith.constant 0 : index
    %11 = vector.load %arg5[%c0_7, %c0_8] : memref<8x512xf32, #tpu.memory_space<vmem>>, vector<8x512xf32>
    tpu.vector_store %arg5[%c0_7, %c0_8], %10 {strides = array<i32>} : memref<8x512xf32, #tpu.memory_space<vmem>>, vector<8x512xf32>,
    return
  }
  func.func @transform_0(%arg0: i32) -> (i32, i32) {
    %c0_i32 = arith.constant 0 : i32
    %c0_i32_0 = arith.constant 0 : i32
    return %c0_i32, %arg0 : i32, i32
  }
  func.func @transform_1(%arg0: i32) -> (i32, i32) {
    %c0_i32 = arith.constant 0 : i32
    %c0_i32_0 = arith.constant 0 : i32
    %c0_i32_1 = arith.constant 0 : i32
    return %c0_i32, %c0_i32_0 : i32, i32
  }
  func.func @transform_2(%arg0: i32) -> (i32, i32) {
    %c0_i32 = arith.constant 0 : i32
    %c0_i32_0 = arith.constant 0 : i32
    %c0_i32_1 = arith.constant 0 : i32
    return %c0_i32, %c0_i32_0 : i32, i32
  }
  func.func @transform_3(%arg0: i32) -> (i32, i32) {
    %c0_i32 = arith.constant 0 : i32
    %c0_i32_0 = arith.constant 0 : i32
    return %c0_i32, %arg0 : i32, i32
  }
  func.func @transform_4(%arg0: i32) -> (i32, i32) {
    %c0_i32 = arith.constant 0 : i32
    %c0_i32_0 = arith.constant 0 : i32
    return %c0_i32, %arg0 : i32, i32
  }
}

</mosaic_0001>

<bundles_post_ra>
// kernel: basic_block_forward.5
= control target key start
LH: loop header
LB: loop body
LE: loop exit
PB: predicated region body
PF: predicated region fallthrough
CT: control target
= control target key end

     0   :  { %s330_s12 = smov 0   ;;  %s353_s0 = inlined_call_operand.vmem [shape: f32[8,1024], index: 0, kind: input, shape index: {}]   ;;  %s354_s1 = inlined_call_operand.vmem [shape: f32[8,1], index: 1, kind: input, shape index: {}]   ;;  %s355_s2 = inlined_call_operand.vmem [shape: f32[8,1], index: 2, kind: input, shape index: {}]   ;;  %s356_s3 = inlined_call_operand.vmem [shape: bf16[8,1024], index: 3, kind: output, shape index: {}]  }
   0x1 LB: > { %s276_s13 = sadd.s32 4294967295, %s307_s12   ;;  %p280_p0 = scmp.ge.s32.totalorder %s307_s12, 1  ;;  %s307_s12 = sphi %s330_s12, %s13_s12  }
   0x2   : > { %p138_p1 = scmp.lt.s32.totalorder %s307_s12, 3 }
   0x4   : > { %p139_p2 = pnand %p280_p0, %p138_p1 }
   0x5   : > { %v178_v0 = vld [vmem:[%s354_s1] sm:$0xff] (!%p139_p2)  ;;  %v309_v1 = vmov (!%p139_p2), 0   ;;  %s281_s18 = sshll.u32 (!%p139_p2), %s276_s13, 2 }
   0x6   : > { %142 = sbr.rel (%p139_p2) target bundleno = 146 (0x92), region = 32  ;;  %300 = vset.pattern.permute.xlu0 (!%p139_p2), %v309_v1  ;;  %v188_v2 = vld [vmem:[%s355_s2] sm:$0xff] (!%p139_p2)  ;;  %p163_p3 = scmp.lt.s32.totalorder (!%p139_p2), %s281_s18, 7 }
   0x7   : > { %181 = vperm.xlu0 (!%p139_p2), %300, %v178_v0  }
   0xb   : > { %191 = vperm.xlu0 (!%p139_p2), %300, %v188_v2  }
   0xd   : > { %s358_s18 = smov (!%p163_p3, %s281_s18), 7 }
   0xe   : > { %s282_s19 = sshll.u32 %s358_s18, 3  ;;  %s284_s23 = sshll.u32 %s358_s18, 2 }
   0xf   : > { %s166_s22 = scalar_lea.vmem %s353_s0, %s282_s19  ;;  %s172_s26 = scalar_lea.vmem %s356_s3, %s284_s23 }
  0x10   : > { %v174_v3 = vld [vmem:[%s166_s22] sm:$0xff]  ;;  %v175_v5 = vld [vmem:[%s166_s22 + $0x8] sm:$0xff]  ;;  %v176_v6 = vld [vmem:[%s166_s22 + $0x10] sm:$0xff] }
  0x11   : > { %v177_v7 = vld [vmem:[%s166_s22 + $0x18] sm:$0xff] }
  0x86   : > { %v182_v4 = vpop.permute.xlu0 %181 }
  0x87   : > { %v184_v8 = vmul.f32 %v182_v4, %v174_v3  ;;  %v185_v9 = vmul.f32 %v182_v4, %v175_v5  ;;  %v186_v10 = vmul.f32 %v182_v4, %v176_v6  ;;  %v187_v11 = vmul.f32 %v182_v4, %v177_v7 }
  0x8a   : > { %v192_v12 = vpop.permute.xlu0 %191 }
  0x8b   : > { %v194_v13 = vadd.f32 %v192_v12, %v184_v8  ;;  %v195_v14 = vadd.f32 %v192_v12, %v185_v9  ;;  %v196_v15 = vadd.f32 %v192_v12, %v186_v10  ;;  %v197_v16 = vadd.f32 %v192_v12, %v187_v11 }
  0x8d   : > { %v198_v17 = vmax.f32 %v194_v13, 0.0  ;;  %v199_v18 = vmax.f32 %v195_v14, 0.0  ;;  %v200_v19 = vmax.f32 %v196_v15, 0.0  ;;  %v201_v20 = vmax.f32 %v197_v16, 0.0 }
  0x8f   : > { %v289_v21 = vpack.c.bf16 %v199_v18, %v198_v17  ;;  %v290_v22 = vpack.c.bf16 %v201_v20, %v200_v19 }
  0x91   : > { %218 = vst [vmem:[%s172_s26] sm:$0xff] %v289_v21  ;;  %219 = vst [vmem:[%s172_s26 + $0x8] sm:$0xff] %v290_v22 }
  0x92 PF: > { %s13_s12 = sadd.s32 1, %s307_s12  }
  0x93   : > { %p10_p4 = scmp.ge.s32.totalorder %s13_s12, 4  }
  0x95   :  { %12 = sbr.rel (!%p10_p4) target bundleno = 1 (0x1), region = 62 }

// kernel: basic_block_forward.4
= control target key start
LH: loop header
LB: loop body
LE: loop exit
PB: predicated region body
PF: predicated region fallthrough
CT: control target
= control target key end

     0   :  { %s1280_s15 = smov 0   ;;  %s1282_s16 = smov 0   ;;  %s1528_s0 = inlined_call_operand.vmem [shape: bf16[8,216], index: 0, kind: input, shape index: {}]   ;;  %s1529_s1 = inlined_call_operand.vmem [shape: bf16[216,1024], index: 1, kind: input, shape index: {}]   ;;  %s1530_s2 = inlined_call_operand.vmem [shape: f32[8,1024], index: 2, kind: output, shape index: {0}]   ;;  %s1531_s3 = inlined_call_operand.vmem [shape: f32[8,1024], index: 3, kind: output, shape index: {1}]   ;;  %s1532_s4 = inlined_call_operand.vmem [shape: f32[8,1024], index: 4, kind: output, shape index: {2}]  }
   0x1   :  { %s1284_s17 = smov 0   ;;  %s1286_s18 = smov 0  }
   0x2   :  { %s1288_s19 = smov 0  }
   0x3 LB: > { %s27_s20 = sadd.s32 1, %s1249_s18  ;;  %p64_p1 = scmp.ne.s32.totalorder %s1241_s16, %s1237_s15  ;;  %s1253_s19 = sphi %s1288_s19, %s15_s19   ;;  %s1249_s18 = sphi %s1286_s18, %s1536_s18   ;;  %s1245_s17 = sphi %s1284_s17, %s1535_s17   ;;  %s1241_s16 = sphi %s1282_s16, %s1534_s16   ;;  %s1237_s15 = sphi %s1280_s15, %s1533_s15  }
   0x4   : > { %p29_p0 = scmp.ge.s32.totalorder %s27_s20, 2  ;;  %p65_p2 = scmp.eq.s32.totalorder %s1253_s19, 0 }
   0x5   : > { %s57_s22 = sadd.s32 1, %s1241_s16  ;;  %p1014_p5 = scmp.ge.s32.totalorder %s1253_s19, 2 }
   0x6   : > { %s1538_s20 = smov (%p29_p0, %s27_s20), 0  ;;  %p66_p3 = por %p65_p2, %p64_p1 }
   0x7   : > { %s54_s21 = ssub.s32 %s1249_s18, %s1538_s20  ;;  %173 = sbr.rel (%p1014_p5) target bundleno = 45 (0x2d), region = 20 }
   0x8   : > { %p55_p4 = scmp.eq.s32.totalorder %s54_s21, 0 }
   0xa   : > { %s1315_s23 = scalar_select %p55_p4, %s1241_s16, %s57_s22  }
   0xe   : > { %176 = sbr.rel (!%p66_p3) target bundleno = 45 (0x2d), region = 24  ;;  %s178_s24 = sand.u32 (%p66_p3), 1, %s1241_s16  }
   0xf   : > { %s1088_s25 = sshll.u32 (%p66_p3), %s1249_s18, 4  ;;  %s1089_s26 = smul.u32 (%p66_p3), 432, %s178_s24 }
  0x10   : > { %s1323_s29 = scalar_lea.vmem (%p66_p3), %s1529_s1, %s1088_s25 }
  0x11   : > { %v197_v0 = vld [vmem:[%s1323_s29] sm:$0xff] (%p66_p3)  ;;  %v199_v1 = vld [vmem:[%s1323_s29 + $0x8] sm:$0xff] (%p66_p3)  ;;  %s1331_s30 = scalar_lea.vmem (%p66_p3), [#allocation4], %s1089_s26 }
  0x12   : > { %v201_v2 = vld [vmem:[%s1323_s29 + $0x20] sm:$0xff] (%p66_p3)  ;;  %v203_v3 = vld [vmem:[%s1323_s29 + $0x28] sm:$0xff] (%p66_p3)  ;;  %198 = vst [vmem:[%s1331_s30] sm:$0xff] (%p66_p3), %v197_v0  ;;  %200 = vst [vmem:[%s1331_s30 + $0x8] sm:$0xff] (%p66_p3), %v199_v1 }
  0x13   : > { %v205_v4 = vld [vmem:[%s1323_s29 + $0x40] sm:$0xff] (%p66_p3)  ;;  %v207_v5 = vld [vmem:[%s1323_s29 + $0x48] sm:$0xff] (%p66_p3)  ;;  %202 = vst [vmem:[%s1331_s30 + $0x10] sm:$0xff] (%p66_p3), %v201_v2  ;;  %204 = vst [vmem:[%s1331_s30 + $0x18] sm:$0xff] (%p66_p3), %v203_v3 }
  0x14   : > { %206 = vst [vmem:[%s1331_s30 + $0x20] sm:$0xff] (%p66_p3), %v205_v4  ;;  %208 = vst [vmem:[%s1331_s30 + $0x28] sm:$0xff] (%p66_p3), %v207_v5  ;;  %v209_v6 = vld [vmem:[%s1323_s29 + $0x60] sm:$0xff] (%p66_p3)  ;;  %v211_v7 = vld [vmem:[%s1323_s29 + $0x68] sm:$0xff] (%p66_p3) }
  0x15   : > { %v213_v8 = vld [vmem:[%s1323_s29 + $0x80] sm:$0xff]  ;;  %210 = vst [vmem:[%s1331_s30 + $0x30] sm:$0xff] %v209_v6  ;;  %212 = vst [vmem:[%s1331_s30 + $0x38] sm:$0xff] %v211_v7  ;;  %v215_v9 = vld [vmem:[%s1323_s29 + $0x88] sm:$0xff] }
  0x16   : > { %214 = vst [vmem:[%s1331_s30 + $0x40] sm:$0xff] %v213_v8  ;;  %v217_v10 = vld [vmem:[%s1323_s29 + $0xa0] sm:$0xff]  ;;  %v219_v11 = vld [vmem:[%s1323_s29 + $0xa8] sm:$0xff]  ;;  %216 = vst [vmem:[%s1331_s30 + $0x48] sm:$0xff] %v215_v9 }
  0x17   : > { %218 = vst [vmem:[%s1331_s30 + $0x50] sm:$0xff] %v217_v10  ;;  %220 = vst [vmem:[%s1331_s30 + $0x58] sm:$0xff] %v219_v11  ;;  %v221_v12 = vld [vmem:[%s1323_s29 + $0xc0] sm:$0xff]  ;;  %v223_v13 = vld [vmem:[%s1323_s29 + $0xc8] sm:$0xff] }
  0x18   : > { %v225_v14 = vld [vmem:[%s1323_s29 + $0xe0] sm:$0xff]  ;;  %222 = vst [vmem:[%s1331_s30 + $0x60] sm:$0xff] %v221_v12  ;;  %224 = vst [vmem:[%s1331_s30 + $0x68] sm:$0xff] %v223_v13  ;;  %v227_v15 = vld [vmem:[%s1323_s29 + $0xe8] sm:$0xff] }
  0x19   : > { %226 = vst [vmem:[%s1331_s30 + $0x70] sm:$0xff] %v225_v14  ;;  %v229_v16 = vld [vmem:[%s1323_s29 + $0x100] sm:$0xff]  ;;  %v231_v17 = vld [vmem:[%s1323_s29 + $0x108] sm:$0xff]  ;;  %228 = vst [vmem:[%s1331_s30 + $0x78] sm:$0xff] %v227_v15 }
  0x1a   : > { %230 = vst [vmem:[%s1331_s30 + $0x80] sm:$0xff] %v229_v16  ;;  %232 = vst [vmem:[%s1331_s30 + $0x88] sm:$0xff] %v231_v17  ;;  %v233_v18 = vld [vmem:[%s1323_s29 + $0x120] sm:$0xff]  ;;  %v235_v19 = vld [vmem:[%s1323_s29 + $0x128] sm:$0xff] }
  0x1b   : > { %v237_v20 = vld [vmem:[%s1323_s29 + $0x140] sm:$0xff]  ;;  %234 = vst [vmem:[%s1331_s30 + $0x90] sm:$0xff] %v233_v18  ;;  %236 = vst [vmem:[%s1331_s30 + $0x98] sm:$0xff] %v235_v19  ;;  %v239_v21 = vld [vmem:[%s1323_s29 + $0x148] sm:$0xff] }
  0x1c   : > { %238 = vst [vmem:[%s1331_s30 + $0xa0] sm:$0xff] %v237_v20  ;;  %v241_v22 = vld [vmem:[%s1323_s29 + $0x160] sm:$0xff]  ;;  %v243_v23 = vld [vmem:[%s1323_s29 + $0x168] sm:$0xff]  ;;  %240 = vst [vmem:[%s1331_s30 + $0xa8] sm:$0xff] %v239_v21 }
  0x1d   : > { %242 = vst [vmem:[%s1331_s30 + $0xb0] sm:$0xff] %v241_v22  ;;  %244 = vst [vmem:[%s1331_s30 + $0xb8] sm:$0xff] %v243_v23  ;;  %v245_v24 = vld [vmem:[%s1323_s29 + $0x180] sm:$0xff]  ;;  %v247_v25 = vld [vmem:[%s1323_s29 + $0x188] sm:$0xff] }
  0x1e   : > { %v249_v26 = vld [vmem:[%s1323_s29 + $0x1a0] sm:$0xff]  ;;  %246 = vst [vmem:[%s1331_s30 + $0xc0] sm:$0xff] %v245_v24  ;;  %248 = vst [vmem:[%s1331_s30 + $0xc8] sm:$0xff] %v247_v25  ;;  %v251_v27 = vld [vmem:[%s1323_s29 + $0x1a8] sm:$0xff] }
  0x1f   : > { %250 = vst [vmem:[%s1331_s30 + $0xd0] sm:$0xff] %v249_v26  ;;  %v253_v28 = vld [vmem:[%s1323_s29 + $0x1c0] sm:$0xff]  ;;  %v255_v29 = vld [vmem:[%s1323_s29 + $0x1c8] sm:$0xff]  ;;  %252 = vst [vmem:[%s1331_s30 + $0xd8] sm:$0xff] %v251_v27 }
  0x20   : > { %254 = vst [vmem:[%s1331_s30 + $0xe0] sm:$0xff] %v253_v28  ;;  %256 = vst [vmem:[%s1331_s30 + $0xe8] sm:$0xff] %v255_v29  ;;  %v257_v30 = vld [vmem:[%s1323_s29 + $0x1e0] sm:$0xff]  ;;  %v259_v31 = vld [vmem:[%s1323_s29 + $0x1e8] sm:$0xff] }
  0x21   : > { %v261_v32 = vld [vmem:[%s1323_s29 + $0x200] sm:$0xff]  ;;  %258 = vst [vmem:[%s1331_s30 + $0xf0] sm:$0xff] %v257_v30  ;;  %260 = vst [vmem:[%s1331_s30 + $0xf8] sm:$0xff] %v259_v31  ;;  %v263_v33 = vld [vmem:[%s1323_s29 + $0x208] sm:$0xff] }
  0x22   : > { %262 = vst [vmem:[%s1331_s30 + $0x100] sm:$0xff] %v261_v32  ;;  %v265_v34 = vld [vmem:[%s1323_s29 + $0x220] sm:$0xff]  ;;  %v267_v35 = vld [vmem:[%s1323_s29 + $0x228] sm:$0xff]  ;;  %264 = vst [vmem:[%s1331_s30 + $0x108] sm:$0xff] %v263_v33 }
  0x23   : > { %266 = vst [vmem:[%s1331_s30 + $0x110] sm:$0xff] %v265_v34  ;;  %268 = vst [vmem:[%s1331_s30 + $0x118] sm:$0xff] %v267_v35  ;;  %v269_v36 = vld [vmem:[%s1323_s29 + $0x240] sm:$0xff]  ;;  %v271_v37 = vld [vmem:[%s1323_s29 + $0x248] sm:$0xff] }
  0x24   : > { %v273_v38 = vld [vmem:[%s1323_s29 + $0x260] sm:$0xff]  ;;  %270 = vst [vmem:[%s1331_s30 + $0x120] sm:$0xff] %v269_v36  ;;  %272 = vst [vmem:[%s1331_s30 + $0x128] sm:$0xff] %v271_v37  ;;  %v275_v39 = vld [vmem:[%s1323_s29 + $0x268] sm:$0xff] }
  0x25   : > { %274 = vst [vmem:[%s1331_s30 + $0x130] sm:$0xff] %v273_v38  ;;  %v277_v40 = vld [vmem:[%s1323_s29 + $0x280] sm:$0xff]  ;;  %v279_v41 = vld [vmem:[%s1323_s29 + $0x288] sm:$0xff]  ;;  %276 = vst [vmem:[%s1331_s30 + $0x138] sm:$0xff] %v275_v39 }
  0x26   : > { %278 = vst [vmem:[%s1331_s30 + $0x140] sm:$0xff] %v277_v40  ;;  %280 = vst [vmem:[%s1331_s30 + $0x148] sm:$0xff] %v279_v41  ;;  %v281_v42 = vld [vmem:[%s1323_s29 + $0x2a0] sm:$0xff]  ;;  %v283_v43 = vld [vmem:[%s1323_s29 + $0x2a8] sm:$0xff] }
  0x27   : > { %v285_v44 = vld [vmem:[%s1323_s29 + $0x2c0] sm:$0xff]  ;;  %282 = vst [vmem:[%s1331_s30 + $0x150] sm:$0xff] %v281_v42  ;;  %284 = vst [vmem:[%s1331_s30 + $0x158] sm:$0xff] %v283_v43  ;;  %v287_v45 = vld [vmem:[%s1323_s29 + $0x2c8] sm:$0xff] }
  0x28   : > { %286 = vst [vmem:[%s1331_s30 + $0x160] sm:$0xff] %v285_v44  ;;  %v289_v46 = vld [vmem:[%s1323_s29 + $0x2e0] sm:$0xff]  ;;  %v291_v47 = vld [vmem:[%s1323_s29 + $0x2e8] sm:$0xff]  ;;  %288 = vst [vmem:[%s1331_s30 + $0x168] sm:$0xff] %v287_v45 }
  0x29   : > { %290 = vst [vmem:[%s1331_s30 + $0x170] sm:$0xff] %v289_v46  ;;  %292 = vst [vmem:[%s1331_s30 + $0x178] sm:$0xff] %v291_v47  ;;  %v293_v48 = vld [vmem:[%s1323_s29 + $0x300] sm:$0xff]  ;;  %v295_v49 = vld [vmem:[%s1323_s29 + $0x308] sm:$0xff] }
  0x2a   : > { %v297_v50 = vld [vmem:[%s1323_s29 + $0x320] sm:$0xff]  ;;  %294 = vst [vmem:[%s1331_s30 + $0x180] sm:$0xff] %v293_v48  ;;  %296 = vst [vmem:[%s1331_s30 + $0x188] sm:$0xff] %v295_v49  ;;  %v299_v51 = vld [vmem:[%s1323_s29 + $0x328] sm:$0xff] }
  0x2b   : > { %298 = vst [vmem:[%s1331_s30 + $0x190] sm:$0xff] %v297_v50  ;;  %v301_v52 = vld [vmem:[%s1323_s29 + $0x340] sm:$0xff]  ;;  %v303_v53 = vld [vmem:[%s1323_s29 + $0x348] sm:$0xff]  ;;  %300 = vst [vmem:[%s1331_s30 + $0x198] sm:$0xff] %v299_v51 }
  0x2c   : > { %302 = vst [vmem:[%s1331_s30 + $0x1a0] sm:$0xff] %v301_v52  ;;  %304 = vst [vmem:[%s1331_s30 + $0x1a8] sm:$0xff] %v303_v53 }
  0x2d PF: > { %p1017_p6 = scmp.ge.s32.totalorder %s1253_s19, 1  ;;  %p309_p7 = scmp.lt.s32.totalorder %s1253_s19, 3 }
  0x2f   : > { %p310_p8 = pnand %p1017_p6, %p309_p7 }
  0x30   : > { %s316_s5 = sand.u32 (!%p310_p8), 1, %s1237_s15   ;;  %v1441_v54 = vld [vmem:[%s1528_s0] sm:$0xff] (!%p310_p8)  ;;  %vm718_vm0 = vcmask (!%p310_p8), 719872   ;;  %vm722_vm1 = vcmask (!%p310_p8), 1043456   ;;  %s1018_s10 = sshll.u32 (!%p310_p8), %s1245_s17, 2 }
  0x31   : > { %313 = sbr.rel (%p310_p8) target bundleno = 328 (0x148), region = 47  ;;  %v1025_v55 = vcombine.high (!%p310_p8), %v1441_v54, %v1441_v54  ;;  %v1024_v52 = vcombine.low (!%p310_p8), %v1441_v54, %v1441_v54  ;;  %p356_p9 = scmp.lt.s32.totalorder (!%p310_p8), %s1018_s10, 7 }
  0x32   : > { %s1090_s8 = smul.u32 (!%p310_p8), 432, %s316_s5 }
  0x33   : > { %1083 = vmatprep.mubr.msk.bf16.mxu0 (!%p310_p8), %vm718_vm0, %v1025_v55  ;;  %1085 = vmatprep.mubr.msk.bf16.mxu1 (!%p310_p8), %vm718_vm0, %v1025_v55 }
  0x34   : > { %s1445_s9 = scalar_lea.vmem (!%p310_p8), [#allocation4], %s1090_s8 }
  0x35   : > { %v1131_v56 = vld [vmem:[%s1445_s9 + $0x4] ss:$16 sps:$4 sm:$0xff] (!%p310_p8)   ;;  %v1133_v57 = vld [vmem:[%s1445_s9 + $0xc] ss:$16 sps:$4 sm:$0xff] (!%p310_p8)   ;;  %v1135_v58 = vld [vmem:[%s1445_s9] ss:$16 sps:$4 sm:$0xff] (!%p310_p8)  }
  0x36   : > { %735 = vmatprep.subr.bf16.mxu0 (!%p310_p8), %v1131_v56  ;;  %v1136_v59 = vld [vmem:[%s1445_s9 + $0x8] ss:$16 sps:$4 sm:$0xff] (!%p310_p8)   ;;  %776 = vmatprep.subr.bf16.mxu1 (!%p310_p8), %v1133_v57  ;;  %v1137_v60 = vld [vmem:[%s1445_s9 + $0x24] ss:$16 sps:$4 sm:$0xff] (!%p310_p8)   ;;  %v1139_v61 = vld [vmem:[%s1445_s9 + $0x2c] ss:$16 sps:$4 sm:$0xff] (!%p310_p8)  }
  0x37   : > { %736 = vmatpush1.bf16.msra.mxu0 (!%p310_p8), %v1135_v58  ;;  %777 = vmatpush1.bf16.msra.mxu1 (!%p310_p8), %v1136_v59  ;;  %v1141_v62 = vld [vmem:[%s1445_s9 + $0x20] ss:$16 sps:$4 sm:$0xff] (!%p310_p8)   ;;  %v1142_v63 = vld [vmem:[%s1445_s9 + $0x28] ss:$16 sps:$4 sm:$0xff] (!%p310_p8)   ;;  %v1143_v0 = vld [vmem:[%s1445_s9 + $0x44] ss:$16 sps:$4 sm:$0xff] (!%p310_p8)  }
  0x38   : > { %737 = vmatprep.subr.bf16.mxu0 %v1137_v60  ;;  %778 = vmatprep.subr.bf16.mxu1 %v1139_v61  ;;  %v1145_v1 = vld [vmem:[%s1445_s9 + $0x4c] ss:$16 sps:$4 sm:$0xff]   ;;  %v1147_v2 = vld [vmem:[%s1445_s9 + $0x40] ss:$16 sps:$4 sm:$0xff]   ;;  %v1148_v3 = vld [vmem:[%s1445_s9 + $0x48] ss:$16 sps:$4 sm:$0xff]  }
  0x39   : > { %v1149_v4 = vld [vmem:[%s1445_s9 + $0x64] ss:$16 sps:$4 sm:$0xff]   ;;  %v1151_v5 = vld [vmem:[%s1445_s9 + $0x6c] ss:$16 sps:$4 sm:$0xff]   ;;  %v1153_v6 = vld [vmem:[%s1445_s9 + $0x60] ss:$16 sps:$4 sm:$0xff]  }
  0x3a   : > { %v1154_v7 = vld [vmem:[%s1445_s9 + $0x68] ss:$16 sps:$4 sm:$0xff]   ;;  %v1155_v8 = vld [vmem:[%s1445_s9 + $0x84] ss:$16 sps:$4 sm:$0xff]   ;;  %v1157_v9 = vld [vmem:[%s1445_s9 + $0x8c] ss:$16 sps:$4 sm:$0xff]  }
  0x3b   : > { %738 = vmatpush1.bf16.msra.mxu0 %v1141_v62  ;;  %779 = vmatpush1.bf16.msra.mxu1 %v1142_v63  ;;  %v1159_v10 = vld [vmem:[%s1445_s9 + $0x80] ss:$16 sps:$4 sm:$0xff]   ;;  %v1160_v11 = vld [vmem:[%s1445_s9 + $0x88] ss:$16 sps:$4 sm:$0xff]   ;;  %v1161_v12 = vld [vmem:[%s1445_s9 + $0xa4] ss:$16 sps:$4 sm:$0xff]  }
  0x3c   : > { %739 = vmatprep.subr.bf16.mxu0 %v1143_v0  ;;  %780 = vmatprep.subr.bf16.mxu1 %v1145_v1  ;;  %v1163_v13 = vld [vmem:[%s1445_s9 + $0xac] ss:$16 sps:$4 sm:$0xff]   ;;  %v1165_v14 = vld [vmem:[%s1445_s9 + $0xa0] ss:$16 sps:$4 sm:$0xff]   ;;  %v1166_v15 = vld [vmem:[%s1445_s9 + $0xa8] ss:$16 sps:$4 sm:$0xff]  }
  0x3d   : > { %v1167_v16 = vld [vmem:[%s1445_s9 + $0xc4] ss:$16 sps:$4 sm:$0xff]   ;;  %v1169_v17 = vld [vmem:[%s1445_s9 + $0xcc] ss:$16 sps:$4 sm:$0xff]   ;;  %v1171_v18 = vld [vmem:[%s1445_s9 + $0xc0] ss:$16 sps:$4 sm:$0xff]  }
  0x3e   : > { %v1172_v19 = vld [vmem:[%s1445_s9 + $0xc8] ss:$16 sps:$4 sm:$0xff]   ;;  %v1173_v20 = vld [vmem:[%s1445_s9 + $0xe4] ss:$16 sps:$4 sm:$0xff]   ;;  %v1175_v21 = vld [vmem:[%s1445_s9 + $0xec] ss:$16 sps:$4 sm:$0xff]  }
  0x3f   : > { %740 = vmatpush1.bf16.msra.mxu0 %v1147_v2  ;;  %781 = vmatpush1.bf16.msra.mxu1 %v1148_v3  ;;  %v1177_v22 = vld [vmem:[%s1445_s9 + $0xe0] ss:$16 sps:$4 sm:$0xff]   ;;  %v1178_v23 = vld [vmem:[%s1445_s9 + $0xe8] ss:$16 sps:$4 sm:$0xff]   ;;  %v1179_v24 = vld [vmem:[%s1445_s9 + $0x104] ss:$16 sps:$4 sm:$0xff]  }
  0x40   : > { %741 = vmatprep.subr.bf16.mxu0 %v1149_v4  ;;  %782 = vmatprep.subr.bf16.mxu1 %v1151_v5  ;;  %v1181_v25 = vld [vmem:[%s1445_s9 + $0x10c] ss:$16 sps:$4 sm:$0xff]   ;;  %v1183_v26 = vld [vmem:[%s1445_s9 + $0x100] ss:$16 sps:$4 sm:$0xff]   ;;  %v1184_v27 = vld [vmem:[%s1445_s9 + $0x108] ss:$16 sps:$4 sm:$0xff]  }
  0x41   : > { %v1185_v28 = vld [vmem:[%s1445_s9 + $0x124] ss:$16 sps:$4 sm:$0xff]   ;;  %v1187_v29 = vld [vmem:[%s1445_s9 + $0x12c] ss:$16 sps:$4 sm:$0xff]   ;;  %v1189_v30 = vld [vmem:[%s1445_s9 + $0x120] ss:$16 sps:$4 sm:$0xff]  }
  0x42   : > { %v1190_v31 = vld [vmem:[%s1445_s9 + $0x128] ss:$16 sps:$4 sm:$0xff]   ;;  %v1191_v32 = vld [vmem:[%s1445_s9 + $0x144] ss:$16 sps:$4 sm:$0xff]   ;;  %v1193_v33 = vld [vmem:[%s1445_s9 + $0x14c] ss:$16 sps:$4 sm:$0xff]  }
  0x43   : > { %742 = vmatpush1.bf16.msra.mxu0 %v1153_v6  ;;  %783 = vmatpush1.bf16.msra.mxu1 %v1154_v7  ;;  %v1195_v34 = vld [vmem:[%s1445_s9 + $0x140] ss:$16 sps:$4 sm:$0xff]   ;;  %v1196_v35 = vld [vmem:[%s1445_s9 + $0x148] ss:$16 sps:$4 sm:$0xff]   ;;  %v1197_v36 = vld [vmem:[%s1445_s9 + $0x164] ss:$16 sps:$4 sm:$0xff]  }
  0x44   : > { %743 = vmatprep.subr.bf16.mxu0 %v1155_v8  ;;  %784 = vmatprep.subr.bf16.mxu1 %v1157_v9  ;;  %v1199_v37 = vld [vmem:[%s1445_s9 + $0x16c] ss:$16 sps:$4 sm:$0xff]   ;;  %v1201_v38 = vld [vmem:[%s1445_s9 + $0x160] ss:$16 sps:$4 sm:$0xff]   ;;  %v1202_v39 = vld [vmem:[%s1445_s9 + $0x168] ss:$16 sps:$4 sm:$0xff]  }
  0x45   : > { %v1203_v40 = vld [vmem:[%s1445_s9 + $0x184] ss:$16 sps:$4 sm:$0xff]   ;;  %v1205_v41 = vld [vmem:[%s1445_s9 + $0x18c] ss:$16 sps:$4 sm:$0xff]   ;;  %v1207_v44 = vld [vmem:[%s1445_s9 + $0x180] ss:$16 sps:$4 sm:$0xff]  }
  0x46   : > { %v440_v42 = vld [vmem:[%s1445_s9 + $0x1a0] sm:$0xff]  ;;  %v441_v43 = vld [vmem:[%s1445_s9 + $0x1a8] sm:$0xff]  ;;  %s1540_s10 = smov (!%p356_p9, %s1018_s10), 7 }
  0x47   : > { %744 = vmatpush1.bf16.msra.mxu0 %v1159_v10  ;;  %785 = vmatpush1.bf16.msra.mxu1 %v1160_v11  ;;  %v1208_v45 = vld [vmem:[%s1445_s9 + $0x188] ss:$16 sps:$4 sm:$0xff]   ;;  %v1079_v46 = vcombine.high %v440_v42, %v440_v42  ;;  %v1081_v47 = vcombine.high %v441_v43, %v441_v43  ;;  %v1078_v48 = vcombine.low %v440_v42, %v440_v42  ;;  %s1019_s11 = sshll.u32 %s1540_s10, 3 }
  0x48   : > { %745 = vmatprep.subr.bf16.mxu0 %v1161_v12  ;;  %786 = vmatprep.subr.bf16.mxu1 %v1163_v13  ;;  %v1080_v49 = vcombine.low %v441_v43, %v441_v43  ;;  %s359_s14 = scalar_lea.vmem %s1530_s2, %s1019_s11  ;;  %s366_s22 = scalar_lea.vmem %s1531_s3, %s1019_s11 }
  0x49   : > { %v724_v50 = vsel %vm722_vm1, %v1078_v48, 0  ;;  %s372_s26 = scalar_lea.vmem %s1532_s4, %s1019_s11 }
  0x4a   : > { %v730_v51 = vsel %vm722_vm1, %v1080_v49, 0 }
  0x4b   : > { %746 = vmatpush1.bf16.msra.mxu0 %v1165_v14  ;;  %787 = vmatpush1.bf16.msra.mxu1 %v1166_v15 }
  0x4c   : > { %747 = vmatprep.subr.bf16.mxu0 %v1167_v16  ;;  %788 = vmatprep.subr.bf16.mxu1 %v1169_v17 }
  0x4f   : > { %748 = vmatpush1.bf16.msra.mxu0 %v1171_v18  ;;  %789 = vmatpush1.bf16.msra.mxu1 %v1172_v19 }
  0x50   : > { %749 = vmatprep.subr.bf16.mxu0 %v1173_v20  ;;  %790 = vmatprep.subr.bf16.mxu1 %v1175_v21 }
  0x53   : > { %750 = vmatpush1.bf16.msra.mxu0 %v1177_v22  ;;  %791 = vmatpush1.bf16.msra.mxu1 %v1178_v23 }
  0x54   : > { %751 = vmatprep.subr.bf16.mxu0 %v1179_v24  ;;  %792 = vmatprep.subr.bf16.mxu1 %v1181_v25 }
  0x57   : > { %752 = vmatpush1.bf16.msra.mxu0 %v1183_v26  ;;  %793 = vmatpush1.bf16.msra.mxu1 %v1184_v27 }
  0x58   : > { %753 = vmatprep.subr.bf16.mxu0 %v1185_v28  ;;  %794 = vmatprep.subr.bf16.mxu1 %v1187_v29 }
  0x5b   : > { %754 = vmatpush1.bf16.msra.mxu0 %v1189_v30  ;;  %795 = vmatpush1.bf16.msra.mxu1 %v1190_v31 }
  0x5c   : > { %755 = vmatprep.subr.bf16.mxu0 %v1191_v32  ;;  %796 = vmatprep.subr.bf16.mxu1 %v1193_v33 }
  0x5f   : > { %756 = vmatpush1.bf16.msra.mxu0 %v1195_v34  ;;  %797 = vmatpush1.bf16.msra.mxu1 %v1196_v35 }
  0x60   : > { %757 = vmatprep.subr.bf16.mxu0 %v1197_v36  ;;  %798 = vmatprep.subr.bf16.mxu1 %v1199_v37 }
  0x63   : > { %758 = vmatpush1.bf16.msra.mxu0 %v1201_v38  ;;  %799 = vmatpush1.bf16.msra.mxu1 %v1202_v39 }
  0x64   : > { %759 = vmatprep.subr.bf16.mxu0 %v1203_v40  ;;  %800 = vmatprep.subr.bf16.mxu1 %v1205_v41 }
  0x67   : > { %760 = vmatpush1.bf16.msra.mxu0 %v1207_v44  ;;  %801 = vmatpush1.bf16.msra.mxu1 %v1208_v45 }
  0x68   : > { %1082 = vmatprep.subr.msk.bf16.mxu0 %vm722_vm1, %v1079_v46  ;;  %1084 = vmatprep.subr.msk.bf16.mxu1 %vm722_vm1, %v1081_v47 }
  0x6b   : > { %762 = vmatpush1.bf16.msra.mxu0 %v724_v50  ;;  %803 = vmatpush1.bf16.msra.mxu1 %v730_v51 }
  0x6e   : > { %768 = vmatmul.mubr.bf16.vlgmr.msra.gmra.mrb[0].mxu0 %v1024_v52  ;;  %809 = vmatmul.mubr.bf16.vlgmr.msra.gmra.mrb[0].mxu1 %v1024_v52 }
 0x141   : > { %v769_v53 = vpop.f32.mrb[0].mxu0  ;;  %v810_v54 = vpop.f32.mrb[0].mxu1 }
 0x142   : > { %817 = vst [vmem:[%s359_s14] sm:$0xff] %v769_v53  ;;  %v837_v55 = vmul.f32 %v769_v53, %v769_v53  ;;  %856 = vst [vmem:[%s366_s22] sm:$0xff] %v769_v53  ;;  %v839_v56 = vmul.f32 %v810_v54, %v810_v54  ;;  %v771_v57 = vpop.f32.mrb[1].mxu0  ;;  %v812_v58 = vpop.f32.mrb[1].mxu1 }
 0x143   : > { %818 = vst [vmem:[%s359_s14 + $0x8] sm:$0xff] %v771_v57  ;;  %v838_v59 = vmul.f32 %v771_v57, %v771_v57  ;;  %857 = vst [vmem:[%s366_s22 + $0x8] sm:$0xff] %v771_v57  ;;  %v840_v60 = vmul.f32 %v812_v58, %v812_v58  ;;  %v773_v61 = vpop.f32.mrb[2].mxu0  ;;  %v814_v62 = vpop.f32.mrb[2].mxu1 }
 0x144   : > { %864 = vst [vmem:[%s372_s26] sm:$0xff] %v837_v55  ;;  %819 = vst [vmem:[%s359_s14 + $0x10] sm:$0xff] %v810_v54  ;;  %v774_v63 = vpop.f32.mrb[3].mxu0  ;;  %v815_v0 = vpop.f32.mrb[3].mxu1 }
 0x145   : > { %858 = vst [vmem:[%s366_s22 + $0x10] sm:$0xff] %v810_v54  ;;  %865 = vst [vmem:[%s372_s26 + $0x8] sm:$0xff] %v838_v59 }
 0x146   : > { %820 = vst [vmem:[%s359_s14 + $0x18] sm:$0xff] %v812_v58  ;;  %859 = vst [vmem:[%s366_s22 + $0x18] sm:$0xff] %v812_v58 }
 0x147   : > { %866 = vst [vmem:[%s372_s26 + $0x10] sm:$0xff] %v839_v56  ;;  %867 = vst [vmem:[%s372_s26 + $0x18] sm:$0xff] %v840_v60 }
 0x148 PF: > { %s15_s19 = sadd.s32 1, %s1253_s19   ;;  %s1533_s15 = smov %s1241_s16 }
 0x149   : > { %p12_p10 = scmp.ge.s32.totalorder %s15_s19, 4   ;;  %s1534_s16 = smov %s1315_s23 }
 0x14a   : > { %s1535_s17 = smov %s1249_s18  ;;  %s1536_s18 = smov %s1538_s20 }
 0x14b   :  { %14 = sbr.rel (!%p12_p10) target bundleno = 3 (0x3), region = 118 }

// kernel: basic_block_forward.7
= control target key start
LH: loop header
LB: loop body
LE: loop exit
PB: predicated region body
PF: predicated region fallthrough
CT: control target
= control target key end

     0   :  { %s388_s15 = smov 0   ;;  %s414_s0 = inlined_call_operand.vmem [shape: f32[8,1024], index: 0, kind: input, shape index: {}]   ;;  %s415_s1 = inlined_call_operand.vmem [shape: f32[8,1], index: 1, kind: input, shape index: {}]   ;;  %s416_s2 = inlined_call_operand.vmem [shape: f32[8,1], index: 2, kind: input, shape index: {}]   ;;  %s417_s3 = inlined_call_operand.vmem [shape: f32[8,1024], index: 3, kind: input, shape index: {}]   ;;  %s418_s4 = inlined_call_operand.vmem [shape: f32[8,1024], index: 4, kind: output, shape index: {}]  }
   0x1 LB: > { %s331_s16 = sadd.s32 4294967295, %s360_s15   ;;  %p335_p0 = scmp.ge.s32.totalorder %s360_s15, 1  ;;  %s360_s15 = sphi %s388_s15, %s14_s15  }
   0x2   : > { %p174_p1 = scmp.lt.s32.totalorder %s360_s15, 3 }
   0x4   : > { %p175_p2 = pnand %p335_p0, %p174_p1 }
   0x5   : > { %v227_v0 = vld [vmem:[%s415_s1] sm:$0xff] (!%p175_p2)  ;;  %v362_v1 = vmov (!%p175_p2), 0   ;;  %s336_s21 = sshll.u32 (!%p175_p2), %s331_s16, 2 }
   0x6   : > { %178 = sbr.rel (%p175_p2) target bundleno = 147 (0x93), region = 36  ;;  %353 = vset.pattern.permute.xlu0 (!%p175_p2), %v362_v1  ;;  %v237_v2 = vld [vmem:[%s416_s2] sm:$0xff] (!%p175_p2)  ;;  %p206_p3 = scmp.lt.s32.totalorder (!%p175_p2), %s336_s21, 7 }
   0x7   : > { %230 = vperm.xlu0 (!%p175_p2), %353, %v227_v0  }
   0xb   : > { %240 = vperm.xlu0 (!%p175_p2), %353, %v237_v2  }
   0xd   : > { %s420_s21 = smov (!%p206_p3, %s336_s21), 7 }
   0xe   : > { %s337_s22 = sshll.u32 %s420_s21, 3 }
   0xf   : > { %s209_s25 = scalar_lea.vmem %s414_s0, %s337_s22  ;;  %s215_s28 = scalar_lea.vmem %s417_s3, %s337_s22 }
  0x10   : > { %v223_v3 = vld [vmem:[%s209_s25] sm:$0xff]  ;;  %v224_v5 = vld [vmem:[%s209_s25 + $0x8] sm:$0xff]  ;;  %v225_v6 = vld [vmem:[%s209_s25 + $0x10] sm:$0xff]  ;;  %s221_s5 = scalar_lea.vmem %s418_s4, %s337_s22 }
  0x11   : > { %v226_v7 = vld [vmem:[%s209_s25 + $0x18] sm:$0xff]  ;;  %v247_v13 = vld [vmem:[%s215_s28] sm:$0xff]  ;;  %v248_v14 = vld [vmem:[%s215_s28 + $0x8] sm:$0xff] }
  0x12   : > { %v249_v15 = vld [vmem:[%s215_s28 + $0x10] sm:$0xff]  ;;  %v250_v20 = vld [vmem:[%s215_s28 + $0x18] sm:$0xff] }
  0x86   : > { %v231_v4 = vpop.permute.xlu0 %230 }
  0x87   : > { %v233_v8 = vmul.f32 %v231_v4, %v223_v3  ;;  %v234_v9 = vmul.f32 %v231_v4, %v224_v5  ;;  %v235_v10 = vmul.f32 %v231_v4, %v225_v6  ;;  %v236_v11 = vmul.f32 %v231_v4, %v226_v7 }
  0x8a   : > { %v241_v12 = vpop.permute.xlu0 %240 }
  0x8b   : > { %v243_v16 = vadd.f32 %v241_v12, %v233_v8  ;;  %v244_v17 = vadd.f32 %v241_v12, %v234_v9  ;;  %v245_v18 = vadd.f32 %v241_v12, %v235_v10  ;;  %v246_v19 = vadd.f32 %v241_v12, %v236_v11 }
  0x8d   : > { %v251_v21 = vadd.f32 %v247_v13, %v243_v16  ;;  %v252_v22 = vadd.f32 %v248_v14, %v244_v17  ;;  %v253_v23 = vadd.f32 %v249_v15, %v245_v18  ;;  %v254_v24 = vadd.f32 %v250_v20, %v246_v19 }
  0x8f   : > { %v255_v25 = vmax.f32 %v251_v21, 0.0  ;;  %v256_v26 = vmax.f32 %v252_v22, 0.0  ;;  %v257_v27 = vmax.f32 %v253_v23, 0.0  ;;  %v258_v28 = vmax.f32 %v254_v24, 0.0 }
  0x91   : > { %259 = vst [vmem:[%s221_s5] sm:$0xff] %v255_v25  ;;  %260 = vst [vmem:[%s221_s5 + $0x8] sm:$0xff] %v256_v26 }
  0x92   : > { %261 = vst [vmem:[%s221_s5 + $0x10] sm:$0xff] %v257_v27  ;;  %262 = vst [vmem:[%s221_s5 + $0x18] sm:$0xff] %v258_v28 }
  0x93 PF: > { %s14_s15 = sadd.s32 1, %s360_s15  }
  0x94   : > { %p11_p4 = scmp.ge.s32.totalorder %s14_s15, 4  }
  0x96   :  { %13 = sbr.rel (!%p11_p4) target bundleno = 1 (0x1), region = 69 }

</bundles_post_ra>
